<compile_context>
chip_gen: v7x
topology: tpu7x:2x2x1
jax: 0.10.0
libtpu: 0.0.40
codegen_flags: <defaults>
</compile_context>

<pallas_src>
import math
import functools

import jax
import jax.numpy as jnp
from jax import lax
from jax.experimental import pallas as pl
from jax.experimental.pallas import tpu as pltpu


def _round_up(x, m):
    return (x + m - 1) // m * m


def arcnegface_kernel(label_ref, x_ref, wt_ref, w_ref, out_ref, *,
                      scale, cos_m, sin_m, thresh, mm, alpha, neg_inv_sigma):
    """One (batch-tile, class-tile) block of ArcNegFace logits.

    label_ref: (tb, 1)  int32   global target class id per row
    x_ref:     (tb, D)  float32 raw input rows
    wt_ref:    (tb, D)  float32 L2-normalized weight row of each row's target class
    w_ref:     (tc, D)  bf16    L2-normalized class weights for this class tile
    out_ref:   (tb, tc) float32 scaled logits
    """
    x = x_ref[...]
    # Row L2 normalization: rsqrt (EUP) + mul (VPU) instead of sqrt + divide.
    ex = x * lax.rsqrt(jnp.sum(x * x, axis=-1, keepdims=True))        # (tb, D)

    # Target cosine cos[i, label[i]] in f32 (independent of the class tile).
    cos_y = jnp.sum(ex * wt_ref[...], axis=-1, keepdims=True)         # (tb, 1)

    # cos(acos(c) + m) = c*cos(m) - sqrt(1 - c^2)*sin(m); else c - mm.
    sin_y = jnp.sqrt(jnp.maximum(1.0 - cos_y * cos_y, 0.0))
    a_y = jnp.where(cos_y > thresh, cos_y * cos_m - sin_y * sin_m, cos_y - mm)

    # Cosine similarities for this class tile: bf16 MXU matmul, f32 accumulate,
    # contracting (tb,D) x (tc,D) directly (no transpose of the weight).
    cos = lax.dot_general(
        ex.astype(jnp.bfloat16), w_ref[...],
        dimension_numbers=(((1,), (1,)), ((), ())),
        preferred_element_type=jnp.float32)                           # (tb, tc)

    # Negative re-weighting: t*cos + t - 1 == t*(cos + 1) - 1,
    # with 1/sigma folded into a single multiplicative constant.
    diff = cos - a_y
    t_scale = alpha * jnp.exp((diff * diff) * neg_inv_sigma)
    neg = t_scale * (cos + 1.0) - 1.0

    # One-hot of the target class within this class tile (global offset j*tc).
    tb_sz, tc_sz = cos.shape
    col0 = pl.program_id(1) * tc_sz
    class_ids = col0 + lax.broadcasted_iota(jnp.int32, (tb_sz, tc_sz), 1)
    one_hot = class_ids == label_ref[...]

    # output = scale * (one_hot * a_y + (1 - one_hot) * neg)
    out_ref[...] = (scale * jnp.where(one_hot, a_y, neg)).astype(out_ref.dtype)


def arcnegface_logits(x, weight, label, *, scale=64.0, margin=0.5,
                      alpha=1.2, sigma=2.0, tb=128, tc=512):
    """Pallas-computed ArcNegFace logits (easy_margin=False branch)."""
    B, D = x.shape
    C, D2 = weight.shape
    assert D == D2

    cos_m = math.cos(margin)
    sin_m = math.sin(margin)
    thresh = math.cos(math.pi - margin)
    mm = math.sin(math.pi - margin) * margin

    # Weight L2 normalization hoisted out of the kernel (done exactly once).
    w32 = weight.astype(jnp.float32)
    ew = w32 * lax.rsqrt(jnp.sum(w32 * w32, axis=-1, keepdims=True))   # (C, D)

    # Per-sample normalized target weight row (f32) so cos_y stays exact and
    # the class-tiled kernel never needs the label column to be in its tile.
    lbl = label.astype(jnp.int32)
    wt = jnp.take(ew, lbl, axis=0)                                     # (B, D)

    # Tile sizing: large batch tiles for MXU occupancy, lane-dense (128x) class
    # tiles, clamped so tiny demo shapes still work without huge padding.
    tb = min(tb, _round_up(B, 8))
    tc = min(tc, _round_up(C, 128))
    B_pad = _round_up(B, tb)
    C_pad = _round_up(C, tc)

    x32 = x.astype(jnp.float32)
    if B_pad != B:
        # Pad rows with ones (avoids 0-norm NaNs in rows that get sliced off).
        x32 = jnp.pad(x32, ((0, B_pad - B), (0, 0)), constant_values=1.0)
        wt = jnp.pad(wt, ((0, B_pad - B), (0, 0)))
        lbl = jnp.pad(lbl, (0, B_pad - B))
    if C_pad != C:
        ew = jnp.pad(ew, ((0, C_pad - C), (0, 0)))

    ew_bf16 = ew.astype(jnp.bfloat16)       # streamed class-weight tiles in bf16
    label2d = lbl.reshape(B_pad, 1)

    kernel = functools.partial(
        arcnegface_kernel,
        scale=float(scale), cos_m=float(cos_m), sin_m=float(sin_m),
        thresh=float(thresh), mm=float(mm), alpha=float(alpha),
        neg_inv_sigma=-1.0 / float(sigma))

    out = pl.pallas_call(
        kernel,
        out_shape=jax.ShapeDtypeStruct((B_pad, C_pad), jnp.float32),
        grid_spec=pltpu.PrefetchScalarGridSpec(
            num_scalar_prefetch=0,
            grid=(B_pad // tb, C_pad // tc),
            in_specs=[
                pl.BlockSpec((tb, 1), lambda i, j: (i, 0)),    # labels
                pl.BlockSpec((tb, D), lambda i, j: (i, 0)),    # input rows
                pl.BlockSpec((tb, D), lambda i, j: (i, 0)),    # target weight rows
                pl.BlockSpec((tc, D), lambda i, j: (j, 0)),    # class-weight tile
            ],
            out_specs=pl.BlockSpec((tb, tc), lambda i, j: (i, j)),
        ),
        compiler_params=pltpu.CompilerParams(
            dimension_semantics=("parallel", "arbitrary"),
            vmem_limit_bytes=48 * 1024 * 1024),
    )(label2d, x32, wt, ew_bf16)

    return out[:B, :C]


def arcnegface_forward(x, weight, label, **kw):
    logits = arcnegface_logits(x, weight, label, **kw)
    # TODO(synk): SoftmaxLossMixin._calc_loss source is not provided; assume
    # DEFAULT_LOSS is standard softmax cross-entropy over the modified logits.
    logz = jax.scipy.special.logsumexp(logits, axis=1)
    tgt = jnp.take_along_axis(
        logits, label.astype(jnp.int32)[:, None], axis=1)[:, 0]
    loss = jnp.mean(logz - tgt)
    return loss, logits


if __name__ == "__main__":
    key = jax.random.PRNGKey(0)
    B, D, C = 16, 32, 16          # batch, in_features, out_features

    k_x, k_w, k_l = jax.random.split(key, 3)
    x = jax.random.normal(k_x, (B, D), dtype=jnp.float32)

    # reset_parameters(): uniform(-stdv, stdv), stdv = 1/sqrt(in_features)
    stdv = 1.0 / math.sqrt(D)
    weight = jax.random.uniform(
        k_w, (C, D), dtype=jnp.float32, minval=-stdv, maxval=stdv)
    label = jax.random.randint(k_l, (B,), 0, C, dtype=jnp.int32)

    loss, logits = arcnegface_forward(x, weight, label)
    jax.block_until_ready((loss, logits))
    print("KERNEL_OK")
</pallas_src>

<mosaic_0001>
module attributes {stable_mosaic.version = 11 : i64} {
  func.func @arcnegface_kernel(%arg0: i32, %arg1: i32, %arg2: memref<16x1xi32, #tpu.memory_space<vmem>>, %arg3: memref<16x32xf32, #tpu.memory_space<vmem>>, %arg4: memref<16x32xf32, #tpu.memory_space<vmem>>, %arg5: memref<128x32xbf16, #tpu.memory_space<vmem>>, %arg6: memref<16x128xf32, #tpu.memory_space<vmem>>) attributes {dimension_semantics = [#tpu.dimension_semantics<parallel>, #tpu.dimension_semantics<arbitrary>], iteration_bounds = array<i64: 1, 1>, scalar_prefetch = 0 : i64, scratch_operands = 0 : i64, tpu.core_type = #tpu.core_type<tc>, window_params = [{transform_indices = @transform_0, window_bounds = array<i64: 16, 1>}, {transform_indices = @transform_1, window_bounds = array<i64: 16, 32>}, {transform_indices = @transform_2, window_bounds = array<i64: 16, 32>}, {transform_indices = @transform_3, window_bounds = array<i64: 128, 32>}, {transform_indices = @transform_4, window_bounds = array<i64: 16, 128>}]} {
    %c0 = arith.constant 0 : index
    %c0_0 = arith.constant 0 : index
    %0 = vector.load %arg3[%c0, %c0_0] : memref<16x32xf32, #tpu.memory_space<vmem>>, vector<16x32xf32>
    %1 = arith.mulf %0, %0 : vector<16x32xf32>
    %cst = arith.constant dense<0.000000e+00> : vector<16xf32>
    %2 = vector.multi_reduction <add>, %1, %cst [1] : vector<16x32xf32> to vector<16xf32>
    %3 = vector.shape_cast %2 : vector<16xf32> to vector<16x1xf32>
    %4 = math.rsqrt %3 : vector<16x1xf32>
    %5 = vector.broadcast %4 : vector<16x1xf32> to vector<16x32xf32>
    %6 = arith.mulf %0, %5 : vector<16x32xf32>
    %c0_1 = arith.constant 0 : index
    %c0_2 = arith.constant 0 : index
    %7 = vector.load %arg4[%c0_1, %c0_2] : memref<16x32xf32, #tpu.memory_space<vmem>>, vector<16x32xf32>
    %8 = arith.mulf %6, %7 : vector<16x32xf32>
    %cst_3 = arith.constant dense<0.000000e+00> : vector<16xf32>
    %9 = vector.multi_reduction <add>, %8, %cst_3 [1] : vector<16x32xf32> to vector<16xf32>
    %10 = vector.shape_cast %9 : vector<16xf32> to vector<16x1xf32>
    %11 = arith.mulf %10, %10 : vector<16x1xf32>
    %cst_4 = arith.constant 1.000000e+00 : f32
    %12 = vector.broadcast %cst_4 : f32 to vector<16x1xf32>
    %13 = arith.subf %12, %11 : vector<16x1xf32>
    %cst_5 = arith.constant 0.000000e+00 : f32
    %14 = vector.broadcast %cst_5 : f32 to vector<16x1xf32>
    %15 = arith.maximumf %13, %14 : vector<16x1xf32>
    %16 = math.sqrt %15 : vector<16x1xf32>
    %cst_6 = arith.constant -0.87758255 : f32
    %17 = vector.broadcast %cst_6 : f32 to vector<16x1xf32>
    %18 = arith.cmpf ogt, %10, %17 : vector<16x1xf32>
    %cst_7 = arith.constant 0.87758255 : f32
    %19 = vector.broadcast %cst_7 : f32 to vector<16x1xf32>
    %20 = arith.mulf %10, %19 : vector<16x1xf32>
    %cst_8 = arith.constant 0.47942555 : f32
    %21 = vector.broadcast %cst_8 : f32 to vector<16x1xf32>
    %22 = arith.mulf %16, %21 : vector<16x1xf32>
    %23 = arith.subf %20, %22 : vector<16x1xf32>
    %cst_9 = arith.constant 0.239712775 : f32
    %24 = vector.broadcast %cst_9 : f32 to vector<16x1xf32>
    %25 = arith.subf %10, %24 : vector<16x1xf32>
    %26 = arith.select %18, %23, %25 : vector<16x1xi1>, vector<16x1xf32>
    %27 = arith.truncf %6 : vector<16x32xf32> to vector<16x32xbf16>
    %c0_10 = arith.constant 0 : index
    %c0_11 = arith.constant 0 : index
    %28 = vector.load %arg5[%c0_10, %c0_11] : memref<128x32xbf16, #tpu.memory_space<vmem>>, vector<128x32xbf16>
    %cst_12 = arith.constant dense<0.000000e+00> : vector<16x128xf32>
    %29 = tpu.matmul %27, %28, %cst_12 {dimension_numbers = #tpu.dot_dimension_numbers<[1], [1], [0], [0], [0, 0, 1, 0], [], []>} : vector<16x32xbf16>, vector<128x32xbf16>, vector<16x128xf32> -> vector<16x128xf32>
    %30 = vector.broadcast %26 : vector<16x1xf32> to vector<16x128xf32>
    %31 = arith.subf %29, %30 : vector<16x128xf32>
    %32 = arith.mulf %31, %31 : vector<16x128xf32>
    %cst_13 = arith.constant -5.000000e-01 : f32
    %33 = vector.broadcast %cst_13 : f32 to vector<16x128xf32>
    %34 = arith.mulf %32, %33 : vector<16x128xf32>
    %35 = math.exp %34 : vector<16x128xf32>
    %cst_14 = arith.constant 1.200000e+00 : f32
    %36 = vector.broadcast %cst_14 : f32 to vector<16x128xf32>
    %37 = arith.mulf %36, %35 : vector<16x128xf32>
    %cst_15 = arith.constant 1.000000e+00 : f32
    %38 = vector.broadcast %cst_15 : f32 to vector<16x128xf32>
    %39 = arith.addf %29, %38 : vector<16x128xf32>
    %40 = arith.mulf %37, %39 : vector<16x128xf32>
    %cst_16 = arith.constant 1.000000e+00 : f32
    %41 = vector.broadcast %cst_16 : f32 to vector<16x128xf32>
    %42 = arith.subf %40, %41 : vector<16x128xf32>
    %c128_i32 = arith.constant 128 : i32
    %43 = arith.muli %arg1, %c128_i32 : i32
    %44 = tpu.iota {dimensions = array<i32: 1>} : vector<16x128xi32>
    %45 = vector.broadcast %43 : i32 to vector<16x128xi32>
    %46 = arith.addi %45, %44 : vector<16x128xi32>
    %c0_17 = arith.constant 0 : index
    %c0_18 = arith.constant 0 : index
    %47 = vector.load %arg2[%c0_17, %c0_18] : memref<16x1xi32, #tpu.memory_space<vmem>>, vector<16x1xi32>
    %48 = vector.broadcast %47 : vector<16x1xi32> to vector<16x128xi32>
    %49 = arith.cmpi eq, %46, %48 : vector<16x128xi32>
    %50 = vector.shape_cast %26 : vector<16x1xf32> to vector<16x1xf32>
    %51 = vector.broadcast %50 : vector<16x1xf32> to vector<16x128xf32>
    %52 = arith.select %49, %51, %42 : vector<16x128xi1>, vector<16x128xf32>
    %cst_19 = arith.constant 6.400000e+01 : f32
    %53 = vector.broadcast %cst_19 : f32 to vector<16x128xf32>
    %54 = arith.mulf %53, %52 : vector<16x128xf32>
    %c0_20 = arith.constant 0 : index
    %c0_21 = arith.constant 0 : index
    %55 = vector.load %arg6[%c0_20, %c0_21] : memref<16x128xf32, #tpu.memory_space<vmem>>, vector<16x128xf32>
    tpu.vector_store %arg6[%c0_20, %c0_21], %54 {strides = array<i32>} : memref<16x128xf32, #tpu.memory_space<vmem>>, vector<16x128xf32>,
    return
  }
  func.func @transform_0(%arg0: i32, %arg1: i32) -> (i32, i32) {
    %c0_i32 = arith.constant 0 : i32
    %c0_i32_0 = arith.constant 0 : i32
    return %arg0, %c0_i32 : i32, i32
  }
  func.func @transform_1(%arg0: i32, %arg1: i32) -> (i32, i32) {
    %c0_i32 = arith.constant 0 : i32
    %c0_i32_0 = arith.constant 0 : i32
    return %arg0, %c0_i32 : i32, i32
  }
  func.func @transform_2(%arg0: i32, %arg1: i32) -> (i32, i32) {
    %c0_i32 = arith.constant 0 : i32
    %c0_i32_0 = arith.constant 0 : i32
    return %arg0, %c0_i32 : i32, i32
  }
  func.func @transform_3(%arg0: i32, %arg1: i32) -> (i32, i32) {
    %c0_i32 = arith.constant 0 : i32
    %c0_i32_0 = arith.constant 0 : i32
    return %arg1, %c0_i32 : i32, i32
  }
  func.func @transform_4(%arg0: i32, %arg1: i32) -> (i32, i32) {
    %c0_i32 = arith.constant 0 : i32
    return %arg0, %arg1 : i32, i32
  }
}

</mosaic_0001>

<bundles_post_ra>
// kernel: tpu_custom_call.1
= control target key start
LH: loop header
LB: loop body
LE: loop exit
PB: predicated region body
PF: predicated region fallthrough
CT: control target
= control target key end

     0   :  { %vm23_vm0 = vcmask 261120   ;;  %v350_v4 = vmov 0.0   ;;  %s448_s0 = inlined_call_operand.vmem [shape: s32[16,1], index: 0, kind: input, shape index: {}]   ;;  %s449_s1 = inlined_call_operand.vmem [shape: f32[16,32], index: 1, kind: input, shape index: {}]   ;;  %s450_s2 = inlined_call_operand.vmem [shape: f32[16,32], index: 2, kind: input, shape index: {}]   ;;  %s451_s3 = inlined_call_operand.vmem [shape: bf16[128,32], index: 3, kind: input, shape index: {}]   ;;  %s452_s4 = inlined_call_operand.hbm [shape: f32[16,128], index: 4, kind: output, shape index: {}]  }
   0x1   :  { %v19_v0 = vld [vmem:[%s449_s1] sm:$0xff]  ;;  %v20_v1 = vld [vmem:[%s449_s1 + $0x8] sm:$0xff]  ;;  %278 = vmatprep.subr.bf16.mxu0 %v350_v4 }
   0x2   :  { %v21_v2 = vmul.f32 %v19_v0, %v19_v0  ;;  %v22_v3 = vmul.f32 %v20_v1, %v20_v1  ;;  %v306_v5 = vld [vmem:[%s451_s3] sm:$0xff]   ;;  %v307_v9 = vld [vmem:[%s451_s3 + $0x8] sm:$0xff]  }
   0x3   :  { %v137_v7 = vsel %vm23_vm0, %v306_v5, 0  ;;  %v140_v10 = vsel %vm23_vm0, %v307_v9, 0 }
   0x4   :  { %v24_v6 = vsel %vm23_vm0, %v21_v2, 0.0  ;;  %279 = vmatpush3.bf16.xpose.msra.mxu0 %v137_v7  ;;  %v27_v8 = vsel %vm23_vm0, %v22_v3, 0.0 }
   0x5   :  { %25 = vadd.xlane.f32.xlu0 %v24_v6  ;;  %280 = vmatprep.subr.bf16.mxu0 %v350_v4 }
   0x9   :  { %28 = vadd.xlane.f32.xlu0 %v27_v8 }
   0xa   :  { %9 = vsyncpa [#allocation3], 0  ;;  %v308_v11 = vld [vmem:[%s451_s3 + $0x10] sm:$0xff]   ;;  %v309_v13 = vld [vmem:[%s451_s3 + $0x18] sm:$0xff]   ;;  %vm351_vm1 = vmmov 0   ;;  %v352_v19 = vmov 0  }
   0xb   :  { %v143_v12 = vsel %vm23_vm0, %v308_v11, 0  ;;  %v146_v14 = vsel %vm23_vm0, %v309_v13, 0  ;;  %v310_v15 = vld [vmem:[%s451_s3 + $0x20] sm:$0xff]   ;;  %294 = vmatprep.mubr.msk.bf16.mxu0 %vm351_vm1, %v350_v4  ;;  %v311_v17 = vld [vmem:[%s451_s3 + $0x28] sm:$0xff]   ;;  %304 = vset.pattern.permute.xlu0 %v352_v19  ;;  %v312_v21 = vld [vmem:[%s451_s3 + $0x30] sm:$0xff]  }
   0xc   :  { %281 = vmatpush3.bf16.xpose.msra.mxu0 %v140_v10  ;;  %v149_v16 = vsel %vm23_vm0, %v310_v15, 0  ;;  %v224_v18 = vld [vmem:[%s448_s0] sm:$0xff]  ;;  %305 = vset.pattern.permute.xlu1 %v352_v19  ;;  %v152_v20 = vsel %vm23_vm0, %v311_v17, 0  ;;  %v155_v22 = vsel %vm23_vm0, %v312_v21, 0  ;;  %v313_v23 = vld [vmem:[%s451_s3 + $0x38] sm:$0xff]   ;;  %v35_v32 = vld [vmem:[%s450_s2 + $0x8] sm:$0xff]  ;;  %v220_v15 = vlaneseq }
   0xd   :  { %282 = vmatprep.subr.bf16.mxu0 %v350_v4  ;;  %v158_v24 = vsel %vm23_vm0, %v313_v23, 0  ;;  %v34_v28 = vld [vmem:[%s450_s2] sm:$0xff]  ;;  %v225_v38 = vld [vmem:[%s448_s0 + $0x8] sm:$0xff]  ;;  %s353_s0 = smov [#allocation2]  }
   0xe   :  { %v221_v17 = vand.u32 127, %v220_v15  ;;  %s245_s2 = sshll.u32 %s353_s0, 4  ;;  %s246_s2 = int_to_ptr.vmem [resolvable:$true] %s245_s2 }
   0xf   :  { %s326_s15 = scalar_lea.vmem %s246_s2, 256  ;;  %p331_p1 = scmp.lt.s32.totalorder %s246_s2, %s246_s2 }
  0x10   :  { %p327_p0 = scmp.ne.s32.totalorder %s246_s2, %s326_s15  ;;  %p332_p2 = scmp.lt.s32.totalorder %s326_s15, %s326_s15 }
  0x12   :  { %p333_p3 = por %p332_p2, %p331_p1 }
  0x14   :  { %283 = vmatpush3.bf16.xpose.msra.mxu0 %v143_v12  ;;  %p334_p4 = pnand %p333_p3, %p327_p0 }
  0x15   :  { %284 = vmatprep.subr.bf16.mxu0 %v350_v4 }
  0x1c   :  { %285 = vmatpush3.bf16.xpose.msra.mxu0 %v146_v14 }
  0x1d   :  { %286 = vmatprep.subr.bf16.mxu0 %v350_v4 }
  0x1f   :  { %227 = vperm.xlu0 %304, %v224_v18  }
  0x24   :  { %287 = vmatpush3.bf16.xpose.msra.mxu0 %v149_v16 }
  0x25   :  { %288 = vmatprep.subr.bf16.mxu0 %v350_v4 }
  0x2c   :  { %289 = vmatpush3.bf16.xpose.msra.mxu0 %v152_v20 }
  0x2d   :  { %290 = vmatprep.subr.bf16.mxu0 %v350_v4 }
  0x34   :  { %291 = vmatpush3.bf16.xpose.msra.mxu0 %v155_v22 }
  0x35   :  { %292 = vmatprep.subr.bf16.mxu0 %v350_v4 }
  0x3c   :  { %293 = vmatpush3.bf16.xpose.msra.mxu0 %v158_v24 }
  0x92   :  { %v26_v25 = vpop.xlane.xlu0 %25 }
  0x93   :  { %314 = vrsqrt.f32 %v26_v25 }
  0x96   :  { %v29_v26 = vpop.xlane.xlu0 %28 }
  0x97   :  { %316 = vrsqrt.f32 %v29_v26 }
  0x9d   :  { %v315_v27 = vpop.eup %314 }
  0x9e   :  { %v32_v29 = vmul.f32 %v315_v27, %v19_v0  ;;  %v228_v20 = vpop.permute.xlu0 %227 }
  0x9f   :  { %vm232_vm8 = vcmp.eq.s32.totalorder %v221_v17, %v228_v20 }
  0xa0   :  { %v36_v30 = vmul.f32 %v34_v28, %v32_v29 }
  0xa1   :  { %v317_v31 = vpop.eup %316 }
  0xa2   :  { %v38_v33 = vsel %vm23_vm0, %v36_v30, 0.0  ;;  %v33_v34 = vmul.f32 %v317_v31, %v20_v1 }
  0xa3   :  { %39 = vadd.xlane.f32.xlu1 %v38_v33 }
  0xa4   :  { %v76_v35 = vpack.c.bf16 %v33_v34, %v32_v29  ;;  %v37_v36 = vmul.f32 %v35_v32, %v33_v34 }
  0xa6   :  { %295 = vmatmul.mubr.msk.bf16.vlgmr.msra.gmra.mrb[0].mxu0 %vm23_vm0, %v76_v35  ;;  %v41_v37 = vsel %vm23_vm0, %v37_v36, 0.0 }
  0xa7   :  { %42 = vadd.xlane.f32.xlu1 %v41_v37 }
  0xb8   :  { %230 = vperm.xlu1 %305, %v225_v38  }
 0x130   :  { %v40_v39 = vpop.xlane.xlu1 %39 }
 0x131   :  { %v44_v41 = vmul.f32 %v40_v39, %v40_v39  ;;  %v66_v58 = vmul.f32 0.87758255, %v40_v39  ;;  %v256_v62 = vadd.f32 -0.23971277, %v40_v39  ;;  %vm64_vm6 = vcmp.gt.f32.partialorder %v40_v39, -0.87758255 }
 0x133   :  { %v46_v43 = vsub.f32 1.0, %v44_v41 }
 0x134   :  { %v43_v40 = vpop.xlane.xlu1 %42 }
 0x135   :  { %v45_v42 = vmul.f32 %v43_v40, %v43_v40  ;;  %v48_v45 = vmax.f32 %v46_v43, 0.0  ;;  %v67_v60 = vmul.f32 0.87758255, %v43_v40  ;;  %v257_v0 = vadd.f32 -0.23971277, %v43_v40 }
 0x136   :  { %vm65_vm7 = vcmp.gt.f32.partialorder %v43_v40, -0.87758255 }
 0x137   :  { %v47_v44 = vsub.f32 1.0, %v45_v42  ;;  %318 = vrsqrt.f32 %v48_v45  ;;  %vm52_vm2 = vcmp.eq.f32.partialorder %v48_v45, inf  ;;  %v55_v52 = vand.u32 2147483648, %v48_v45 }
 0x138   :  { %vm54_vm4 = vcmp.eq.f32.partialorder %v48_v45, 0.0  ;;  %v231_v25 = vpop.permute.xlu1 %230 }
 0x139   :  { %v49_v46 = vmax.f32 %v47_v44, 0.0  ;;  %vm233_vm9 = vcmp.eq.s32.totalorder %v221_v17, %v231_v25 }
 0x13b   :  { %320 = vrsqrt.f32 %v49_v46  ;;  %vm59_vm3 = vcmp.eq.f32.partialorder %v49_v46, inf  ;;  %v62_v55 = vand.u32 2147483648, %v49_v46  ;;  %vm61_vm5 = vcmp.eq.f32.partialorder %v49_v46, 0.0 }
 0x141   :  { %v319_v47 = vpop.eup %318 }
 0x142   :  { %v51_v49 = vmul.f32 %v319_v47, %v48_v45 }
 0x144   :  { %v53_v51 = vsel %vm52_vm2, %v48_v45, %v51_v49 }
 0x145   :  { %v321_v48 = vpop.eup %320  ;;  %v56_v54 = vsel %vm54_vm4, %v55_v52, %v53_v51 }
 0x146   :  { %v58_v50 = vmul.f32 %v321_v48, %v49_v46  ;;  %v68_v57 = vmul.f32 0.47942555, %v56_v54 }
 0x148   :  { %v60_v53 = vsel %vm59_vm3, %v49_v46, %v58_v50  ;;  %v70_v61 = vsub.f32 %v66_v58, %v68_v57 }
 0x149   :  { %v63_v56 = vsel %vm61_vm5, %v62_v55, %v60_v53 }
 0x14a   :  { %v69_v59 = vmul.f32 0.47942555, %v63_v56  ;;  %v74_v1 = vsel %vm64_vm6, %v70_v61, %v256_v62 }
 0x14c   :  { %v71_v63 = vsub.f32 %v67_v60, %v69_v59 }
 0x14e   :  { %v75_v5 = vsel %vm65_vm7, %v71_v63, %v257_v0 }
 0x179   :  { %v194_v2 = vpop.f32.mrb[0].mxu0 }
 0x17a   :  { %v201_v3 = vsub.f32 %v194_v2, %v74_v1  ;;  %v296_v4 = vpop.f32.mrb[1].mxu0  ;;  %v213_v19 = vadd.f32 1.0, %v194_v2 }
 0x17b   :  { %v197_v6 = vpop.f32.mrb[2].mxu0 }
 0x17c   :  { %v203_v7 = vmul.f32 %v201_v3, %v201_v3  ;;  %v202_v8 = vsub.f32 %v197_v6, %v75_v5  ;;  %v297_v9 = vpop.f32.mrb[3].mxu0  ;;  %v214_v24 = vadd.f32 1.0, %v197_v6 }
 0x17e   :  { %v205_v10 = vmul.f32 -0.5, %v203_v7  ;;  %v204_v11 = vmul.f32 %v202_v8, %v202_v8 }
 0x180   :  { %v207_v12 = vmul.f32 1.442695, %v205_v10  ;;  %v206_v13 = vmul.f32 -0.5, %v204_v11 }
 0x182   :  { %322 = vpow2.f32 %v207_v12  ;;  %v209_v14 = vmul.f32 1.442695, %v206_v13 }
 0x184   :  { %324 = vpow2.f32 %v209_v14 }
 0x18c   :  { %v323_v16 = vpop.eup %322 }
 0x18d   :  { %v211_v18 = vmul.f32 1.2, %v323_v16 }
 0x18e   :  { %v325_v21 = vpop.eup %324 }
 0x18f   :  { %v215_v22 = vmul.f32 %v213_v19, %v211_v18  ;;  %v212_v23 = vmul.f32 1.2, %v325_v21 }
 0x191   :  { %v267_v26 = vadd.f32 -1.0, %v215_v22  ;;  %v216_v27 = vmul.f32 %v214_v24, %v212_v23 }
 0x193   :  { %v268_v28 = vadd.f32 -1.0, %v216_v27  ;;  %v234_v29 = vsel %vm232_vm8, %v74_v1, %v267_v26 }
 0x194   :  { %v236_v30 = vmul.f32 64.0, %v234_v29 }
 0x195   :  { %v235_v31 = vsel %vm233_vm9, %v75_v5, %v268_v28 }
 0x196   :  { %238 = vst [vmem:[#allocation2] sm:$0xff] %v236_v30  ;;  %v237_v32 = vmul.f32 64.0, %v235_v31 }
 0x198   :  { %239 = vst [vmem:[#allocation2 + $0x8] sm:$0xff] %v237_v32 }
 0x199   :  { %337 = shalt.err (!%p334_p4)
}
 0x19a   :  { %s338_s18 = scalar_lea.hbm %s452_s4, 256 }
 0x19b   :  { %p339_p5 = scmp.ne.s32.totalorder %s452_s4, %s338_s18  ;;  %p342_p6 = scmp.lt.u32.totalorder %s338_s18, %s452_s4 }
 0x19d   :  { %p344_p7 = pnand %p342_p6, %p339_p5 }
 0x19f   :  { %347 = shalt.err (!%p344_p7)
}
 0x1a0   :  { %s354_s1 = smov 128   ;;  %s355_s23 = smov 8  }
 0x1a1   :  { %251 = dma.vmem_to_hbm [thread:$0]  %s246_s2, 256, %s452_s4, [#allocation3], %s354_s1, %s354_s1, %s355_s23  }
 0x1a2   :  { %348 = dma.done.wait [#allocation3], 256  }
 0x1a3   :  { %349 = vsyncadd [#allocation3], 4294967040 }
 0x1a4   :  { %255 = vsyncpa [#allocation3], 1 }

</bundles_post_ra>
